<compile_context>
chip_gen: v7x
topology: tpu7x:2x2x1
jax: 0.10.0
libtpu: 0.0.40
codegen_flags: <defaults>
</compile_context>

<pallas_src>
import jax
import jax.numpy as jnp
from jax.experimental import pallas as pl
from jax.experimental.pallas import tpu as pltpu


def _round_up(n: int, m: int) -> int:
    return ((n + m - 1) // m) * m


def _tensorcores_per_chip() -> int:
    """Tiling hint only: v7x has 2 TensorCores per chip, v5e/v6e have 1."""
    try:
        kind = jax.devices()[0].device_kind.lower()
    except Exception:
        return 1
    return 2 if "v7" in kind else 1


def qnet_mlp_kernel(x_ref, w1_ref, b1_ref, w2_ref, b2_ref, w3_ref, b3_ref, o_ref):
    """Fused 3-layer MLP forward for one batch tile.

    All matmuls are bf16 x bf16 with f32 accumulation (single-pass MXU);
    bias-add and ReLU remain in f32.
    """
    x = x_ref[...]                                                       # bf16 (TB, D_pad)

    h1 = jnp.dot(x, w1_ref[...], preferred_element_type=jnp.float32) + b1_ref[...]
    h1 = jnp.maximum(h1, 0.0).astype(jnp.bfloat16)                       # (TB, H_pad)

    h2 = jnp.dot(h1, w2_ref[...], preferred_element_type=jnp.float32) + b2_ref[...]
    h2 = jnp.maximum(h2, 0.0).astype(jnp.bfloat16)                       # (TB, H_pad)

    q = jnp.dot(h2, w3_ref[...], preferred_element_type=jnp.float32) + b3_ref[...]
    o_ref[...] = q.astype(o_ref.dtype)                                   # bf16 lane-dense store


def prepare_qnet_params(params):
    """One-time padding + bf16 cast of weights (hoisted out of the forward).

    Call this at init / after each optimizer step, NOT per forward pass.
    Weights -> bf16 (MXU operands); biases stay f32 (added post-accumulation).
    """
    w1, b1, w2, b2, w3, b3 = params
    d_in, h_dim = w1.shape
    a_dim = w3.shape[1]

    d_pad = _round_up(d_in, 16)     # bf16 sublane-packing granularity for W1's contraction dim
    h_pad = _round_up(h_dim, 128)   # lane-dense hidden
    a_pad = _round_up(a_dim, 128)   # lane-dense output -> unmasked stores

    w1p = jnp.zeros((d_pad, h_pad), jnp.bfloat16).at[:d_in, :h_dim].set(w1.astype(jnp.bfloat16))
    b1p = jnp.zeros((1, h_pad), jnp.float32).at[:, :h_dim].set(b1)
    w2p = jnp.zeros((h_pad, h_pad), jnp.bfloat16).at[:h_dim, :h_dim].set(w2.astype(jnp.bfloat16))
    b2p = jnp.zeros((1, h_pad), jnp.float32).at[:, :h_dim].set(b2)
    w3p = jnp.zeros((h_pad, a_pad), jnp.bfloat16).at[:h_dim, :a_dim].set(w3.astype(jnp.bfloat16))
    b3p = jnp.zeros((1, a_pad), jnp.float32).at[:, :a_dim].set(b3)

    meta = dict(d_in=d_in, h_dim=h_dim, a_dim=a_dim,
                d_pad=d_pad, h_pad=h_pad, a_pad=a_pad)
    return (w1p, b1p, w2p, b2p, w3p, b3p), meta


def qnetwork_forward(x, padded_params, meta, *, max_tb=1024):
    """Fused DQN MLP forward. Only x is padded per call; params are pre-padded bf16."""
    w1p, b1p, w2p, b2p, w3p, b3p = padded_params
    d_in, a_dim = meta["d_in"], meta["a_dim"]
    d_pad, h_pad, a_pad = meta["d_pad"], meta["h_pad"], meta["a_pad"]

    B = x.shape[0]

    # Tile = ceil(B / num_tensorcores), rounded to 16 sublanes (bf16), capped at max_tb:
    #   v5e/v6e -> one grid step (no per-step overhead), v7x -> exactly one tile per TC.
    n_cores = _tensorcores_per_chip()
    tb_eff = min(max_tb, _round_up(max(1, -(-B // n_cores)), 16))
    b_pad = _round_up(B, tb_eff)
    nb = b_pad // tb_eff

    # bf16 input stream halves HBM traffic; zero-pad to the tile grid.
    xp = jnp.zeros((b_pad, d_pad), jnp.bfloat16).at[:B, :d_in].set(x.astype(jnp.bfloat16))

    def const(shape):
        # Weights/biases: same block every grid step -> VMEM-resident across the grid.
        return pl.BlockSpec(shape, lambda i: (0, 0))

    out = pl.pallas_call(
        qnet_mlp_kernel,
        out_shape=jax.ShapeDtypeStruct((b_pad, a_pad), jnp.bfloat16),
        grid=(nb,),
        in_specs=[
            pl.BlockSpec((tb_eff, d_pad), lambda i: (i, 0)),   # x tile, tracks batch index
            const((d_pad, h_pad)), const((1, h_pad)),          # W1 (bf16), b1 (f32)
            const((h_pad, h_pad)), const((1, h_pad)),          # W2, b2
            const((h_pad, a_pad)), const((1, a_pad)),          # W3, b3
        ],
        out_specs=pl.BlockSpec((tb_eff, a_pad), lambda i: (i, 0)),
        compiler_params=pltpu.CompilerParams(
            dimension_semantics=("parallel",)),                # v7x: batch splits across 2 TCs
    )(xp, w1p, b1p, w2p, b2p, w3p, b3p)

    # Downstream argmax / TD-target code could consume the padded (b_pad, a_pad) block
    # directly (masking lanes >= a_dim); we slice here to return the exact logical shape.
    return out[:B, :a_dim]


def init_linear(key, fan_in, fan_out):
    """Deterministic init mirroring torch.nn.Linear's U(-1/sqrt(fan_in), +)."""
    kw, kb = jax.random.split(key)
    bound = 1.0 / jnp.sqrt(jnp.float32(fan_in))
    w = jax.random.uniform(kw, (fan_in, fan_out), jnp.float32, -bound, bound)
    b = jax.random.uniform(kb, (1, fan_out), jnp.float32, -bound, bound)
    return w, b


def reference_forward(x, params):
    """Pure-JAX reference with the same bf16 quantization boundaries as the kernel."""
    w1, b1, w2, b2, w3, b3 = params
    q16 = lambda a: a.astype(jnp.bfloat16).astype(jnp.float32)
    hp = jax.lax.Precision.HIGHEST
    h1 = jnp.maximum(jnp.dot(q16(x), q16(w1), precision=hp) + b1, 0.0)
    h2 = jnp.maximum(jnp.dot(q16(h1), q16(w2), precision=hp) + b2, 0.0)
    return jnp.dot(q16(h2), q16(w3), precision=hp) + b3


if __name__ == "__main__":
    # DQN-style shapes: state_dim=4, hidden=32, n_actions=2; batch=256 gives one
    # grid step on v5e/v6e and two parallel (per-TensorCore) steps on v7x.
    B, D_IN, H, A = 256, 4, 32, 2

    key = jax.random.PRNGKey(0)
    kx, k1, k2, k3 = jax.random.split(key, 4)

    x = jax.random.normal(kx, (B, D_IN), jnp.float32)
    w1, b1 = init_linear(k1, D_IN, H)
    w2, b2 = init_linear(k2, H, H)
    w3, b3 = init_linear(k3, H, A)
    params = (w1, b1, w2, b2, w3, b3)

    # Weight padding / bf16 cast is hoisted out of the forward (done once here).
    padded_params, meta = prepare_qnet_params(params)

    fwd = jax.jit(lambda xb, pp: qnetwork_forward(xb, pp, meta))
    out = jax.block_until_ready(fwd(x, padded_params))

    ref = reference_forward(x, params)
    assert out.shape == (B, A)
    err = float(jnp.max(jnp.abs(out.astype(jnp.float32) - ref)))
    assert jnp.allclose(out.astype(jnp.float32), ref, atol=1e-2, rtol=1e-2), err

    print("KERNEL_OK")
</pallas_src>

<mosaic_0001>
module attributes {stable_mosaic.version = 11 : i64} {
  func.func @qnet_mlp_kernel(%arg0: i32, %arg1: memref<256x16xbf16, #tpu.memory_space<vmem>>, %arg2: memref<16x128xbf16, #tpu.memory_space<vmem>>, %arg3: memref<1x128xf32, #tpu.memory_space<vmem>>, %arg4: memref<128x128xbf16, #tpu.memory_space<vmem>>, %arg5: memref<1x128xf32, #tpu.memory_space<vmem>>, %arg6: memref<128x128xbf16, #tpu.memory_space<vmem>>, %arg7: memref<1x128xf32, #tpu.memory_space<vmem>>, %arg8: memref<256x128xbf16, #tpu.memory_space<vmem>>) attributes {dimension_semantics = [#tpu.dimension_semantics<parallel>], iteration_bounds = array<i64: 1>, scalar_prefetch = 0 : i64, scratch_operands = 0 : i64, tpu.core_type = #tpu.core_type<tc>, window_params = [{transform_indices = @transform_0, window_bounds = array<i64: 256, 16>}, {pipeline_mode = #tpu.pipeline_mode<synchronous>, transform_indices = @transform_1, window_bounds = array<i64: 16, 128>}, {pipeline_mode = #tpu.pipeline_mode<synchronous>, transform_indices = @transform_2, window_bounds = array<i64: 1, 128>}, {pipeline_mode = #tpu.pipeline_mode<synchronous>, transform_indices = @transform_3, window_bounds = array<i64: 128, 128>}, {pipeline_mode = #tpu.pipeline_mode<synchronous>, transform_indices = @transform_4, window_bounds = array<i64: 1, 128>}, {pipeline_mode = #tpu.pipeline_mode<synchronous>, transform_indices = @transform_5, window_bounds = array<i64: 128, 128>}, {pipeline_mode = #tpu.pipeline_mode<synchronous>, transform_indices = @transform_6, window_bounds = array<i64: 1, 128>}, {transform_indices = @transform_7, window_bounds = array<i64: 256, 128>}]} {
    %c0 = arith.constant 0 : index
    %c0_0 = arith.constant 0 : index
    %0 = vector.load %arg1[%c0, %c0_0] : memref<256x16xbf16, #tpu.memory_space<vmem>>, vector<256x16xbf16>
    %c0_1 = arith.constant 0 : index
    %c0_2 = arith.constant 0 : index
    %1 = vector.load %arg2[%c0_1, %c0_2] : memref<16x128xbf16, #tpu.memory_space<vmem>>, vector<16x128xbf16>
    %cst = arith.constant dense<0.000000e+00> : vector<256x128xf32>
    %2 = tpu.matmul %0, %1, %cst {dimension_numbers = #tpu.dot_dimension_numbers<[1], [0], [0], [1], [0, 0, 1, 1], [], []>} : vector<256x16xbf16>, vector<16x128xbf16>, vector<256x128xf32> -> vector<256x128xf32>
    %c0_3 = arith.constant 0 : index
    %c0_4 = arith.constant 0 : index
    %3 = vector.load %arg3[%c0_3, %c0_4] : memref<1x128xf32, #tpu.memory_space<vmem>>, vector<1x128xf32>
    %4 = vector.broadcast %3 : vector<1x128xf32> to vector<256x128xf32>
    %5 = arith.addf %2, %4 : vector<256x128xf32>
    %cst_5 = arith.constant 0.000000e+00 : f32
    %6 = vector.broadcast %cst_5 : f32 to vector<256x128xf32>
    %7 = arith.maximumf %5, %6 : vector<256x128xf32>
    %8 = arith.truncf %7 : vector<256x128xf32> to vector<256x128xbf16>
    %c0_6 = arith.constant 0 : index
    %c0_7 = arith.constant 0 : index
    %9 = vector.load %arg4[%c0_6, %c0_7] : memref<128x128xbf16, #tpu.memory_space<vmem>>, vector<128x128xbf16>
    %cst_8 = arith.constant dense<0.000000e+00> : vector<256x128xf32>
    %10 = tpu.matmul %8, %9, %cst_8 {dimension_numbers = #tpu.dot_dimension_numbers<[1], [0], [0], [1], [0, 0, 1, 1], [], []>} : vector<256x128xbf16>, vector<128x128xbf16>, vector<256x128xf32> -> vector<256x128xf32>
    %c0_9 = arith.constant 0 : index
    %c0_10 = arith.constant 0 : index
    %11 = vector.load %arg5[%c0_9, %c0_10] : memref<1x128xf32, #tpu.memory_space<vmem>>, vector<1x128xf32>
    %12 = vector.broadcast %11 : vector<1x128xf32> to vector<256x128xf32>
    %13 = arith.addf %10, %12 : vector<256x128xf32>
    %cst_11 = arith.constant 0.000000e+00 : f32
    %14 = vector.broadcast %cst_11 : f32 to vector<256x128xf32>
    %15 = arith.maximumf %13, %14 : vector<256x128xf32>
    %16 = arith.truncf %15 : vector<256x128xf32> to vector<256x128xbf16>
    %c0_12 = arith.constant 0 : index
    %c0_13 = arith.constant 0 : index
    %17 = vector.load %arg6[%c0_12, %c0_13] : memref<128x128xbf16, #tpu.memory_space<vmem>>, vector<128x128xbf16>
    %cst_14 = arith.constant dense<0.000000e+00> : vector<256x128xf32>
    %18 = tpu.matmul %16, %17, %cst_14 {dimension_numbers = #tpu.dot_dimension_numbers<[1], [0], [0], [1], [0, 0, 1, 1], [], []>} : vector<256x128xbf16>, vector<128x128xbf16>, vector<256x128xf32> -> vector<256x128xf32>
    %c0_15 = arith.constant 0 : index
    %c0_16 = arith.constant 0 : index
    %19 = vector.load %arg7[%c0_15, %c0_16] : memref<1x128xf32, #tpu.memory_space<vmem>>, vector<1x128xf32>
    %20 = vector.broadcast %19 : vector<1x128xf32> to vector<256x128xf32>
    %21 = arith.addf %18, %20 : vector<256x128xf32>
    %22 = arith.truncf %21 : vector<256x128xf32> to vector<256x128xbf16>
    %c0_17 = arith.constant 0 : index
    %c0_18 = arith.constant 0 : index
    %23 = vector.load %arg8[%c0_17, %c0_18] : memref<256x128xbf16, #tpu.memory_space<vmem>>, vector<256x128xbf16>
    tpu.vector_store %arg8[%c0_17, %c0_18], %22 {strides = array<i32>} : memref<256x128xbf16, #tpu.memory_space<vmem>>, vector<256x128xbf16>,
    return
  }
  func.func @transform_0(%arg0: i32) -> (i32, i32) {
    %c0_i32 = arith.constant 0 : i32
    %c0_i32_0 = arith.constant 0 : i32
    return %arg0, %c0_i32 : i32, i32
  }
  func.func @transform_1(%arg0: i32) -> (i32, i32) {
    %c0_i32 = arith.constant 0 : i32
    %c0_i32_0 = arith.constant 0 : i32
    %c0_i32_1 = arith.constant 0 : i32
    return %c0_i32, %c0_i32_0 : i32, i32
  }
  func.func @transform_2(%arg0: i32) -> (i32, i32) {
    %c0_i32 = arith.constant 0 : i32
    %c0_i32_0 = arith.constant 0 : i32
    %c0_i32_1 = arith.constant 0 : i32
    return %c0_i32, %c0_i32_0 : i32, i32
  }
  func.func @transform_3(%arg0: i32) -> (i32, i32) {
    %c0_i32 = arith.constant 0 : i32
    %c0_i32_0 = arith.constant 0 : i32
    %c0_i32_1 = arith.constant 0 : i32
    return %c0_i32, %c0_i32_0 : i32, i32
  }
  func.func @transform_4(%arg0: i32) -> (i32, i32) {
    %c0_i32 = arith.constant 0 : i32
    %c0_i32_0 = arith.constant 0 : i32
    %c0_i32_1 = arith.constant 0 : i32
    return %c0_i32, %c0_i32_0 : i32, i32
  }
  func.func @transform_5(%arg0: i32) -> (i32, i32) {
    %c0_i32 = arith.constant 0 : i32
    %c0_i32_0 = arith.constant 0 : i32
    %c0_i32_1 = arith.constant 0 : i32
    return %c0_i32, %c0_i32_0 : i32, i32
  }
  func.func @transform_6(%arg0: i32) -> (i32, i32) {
    %c0_i32 = arith.constant 0 : i32
    %c0_i32_0 = arith.constant 0 : i32
    %c0_i32_1 = arith.constant 0 : i32
    return %c0_i32, %c0_i32_0 : i32, i32
  }
  func.func @transform_7(%arg0: i32) -> (i32, i32) {
    %c0_i32 = arith.constant 0 : i32
    %c0_i32_0 = arith.constant 0 : i32
    return %arg0, %c0_i32 : i32, i32
  }
}

</mosaic_0001>

<bundles_post_ra>
// kernel: _lambda_.1
= control target key start
LH: loop header
LB: loop body
LE: loop exit
PB: predicated region body
PF: predicated region fallthrough
CT: control target
= control target key end

     0   :  { %vm154_vm0 = vcmask 130048   ;;  %s1849_s1 = inlined_call_operand.vmem [shape: bf16[16,128], index: 1, kind: input, shape index: {}]   ;;  %s1850_s0 = inlined_call_operand.vmem [shape: bf16[256,16], index: 0, kind: input, shape index: {}]   ;;  %s1851_s3 = inlined_call_operand.vmem [shape: bf16[128,128], index: 3, kind: input, shape index: {}]   ;;  %s1852_s5 = inlined_call_operand.vmem [shape: bf16[128,128], index: 5, kind: input, shape index: {}]   ;;  %s1853_s2 = inlined_call_operand.vmem [shape: f32[1,128], index: 2, kind: input, shape index: {}]   ;;  %s1854_s4 = inlined_call_operand.vmem [shape: f32[1,128], index: 4, kind: input, shape index: {}]   ;;  %s1855_s6 = inlined_call_operand.vmem [shape: f32[1,128], index: 6, kind: input, shape index: {}]   ;;  %s1856_s7 = inlined_call_operand.vmem [shape: bf16[256,128], index: 7, kind: output, shape index: {}]  }
   0x1   :  { %v1496_v0 = vld [vmem:[%s1849_s1] sm:$0xff]   ;;  %v1498_v2 = vld [vmem:[%s1850_s0 + $0x8] sm:$0xff]   ;;  %v1499_v3 = vld [vmem:[%s1850_s0 + $0x10] sm:$0xff]  }
   0x2   :  { %v1497_v1 = vld [vmem:[%s1850_s0] sm:$0xff]   ;;  %1364 = vmatprep.subr.bf16.mxu0 %v1496_v0  ;;  %1494 = vmatprep.subr.bf16.mxu1 %v1496_v0  ;;  %v1500_v4 = vld [vmem:[%s1850_s0 + $0x18] sm:$0xff]   ;;  %v1506_v7 = vld [vmem:[%s1850_s0 + $0x48] sm:$0xff]  }
   0x3   :  { %1365 = vmatpush3.bf16.msra.mxu0 %v1496_v0  ;;  %1366 = vmatprep.mubr.msk.bf16.mxu0 %vm154_vm0, %v1497_v1  ;;  %v1501_v5 = vld [vmem:[%s1850_s0 + $0x20] sm:$0xff]   ;;  %v1507_v8 = vld [vmem:[%s1850_s0 + $0x50] sm:$0xff]   ;;  %v1508_v9 = vld [vmem:[%s1850_s0 + $0x58] sm:$0xff]  }
   0x4   :  { %1495 = vmatpush3.bf16.msra.mxu1 %v1496_v0  ;;  %v1505_v6 = vld [vmem:[%s1850_s0 + $0x40] sm:$0xff]   ;;  %v1502_v10 = vld [vmem:[%s1850_s0 + $0x28] sm:$0xff]   ;;  %v1503_v14 = vld [vmem:[%s1850_s0 + $0x30] sm:$0xff]  }
   0x5   :  { %1382 = vmatprep.mubr.msk.bf16.mxu1 %vm154_vm0, %v1505_v6  ;;  %v1509_v11 = vld [vmem:[%s1850_s0 + $0x60] sm:$0xff]   ;;  %v1514_v13 = vld [vmem:[%s1851_s3 + $0x8] sm:$0xff]   ;;  %v1515_v15 = vld [vmem:[%s1851_s3 + $0x10] sm:$0xff]  }
   0x6   :  { %1367 = vmatmul.mubr.msk.bf16.vlgmr.msra.gmra.mrb[0].mxu0 %vm154_vm0, %v1498_v2  ;;  %v1513_v12 = vld [vmem:[%s1851_s3] sm:$0xff]   ;;  %v1510_v16 = vld [vmem:[%s1850_s0 + $0x68] sm:$0xff]   ;;  %v1511_v17 = vld [vmem:[%s1850_s0 + $0x70] sm:$0xff]  }
   0x7   :  { %1370 = vmatprep.mubr.msk.bf16.mxu0 %vm154_vm0, %v1499_v3  ;;  %1383 = vmatmul.mubr.msk.bf16.vlgmr.msra.gmra.mrb[0].mxu1 %vm154_vm0, %v1506_v7  ;;  %v1504_v18 = vld [vmem:[%s1850_s0 + $0x38] sm:$0xff]   ;;  %v1517_v20 = vld [vmem:[%s1851_s3 + $0x20] sm:$0xff]   ;;  %v1518_v22 = vld [vmem:[%s1851_s3 + $0x28] sm:$0xff]  }
   0x8   :  { %1386 = vmatprep.mubr.msk.bf16.mxu1 %vm154_vm0, %v1507_v8  ;;  %1398 = vmatprep.subr.bf16.mxu1 %v1513_v12  ;;  %v1516_v19 = vld [vmem:[%s1851_s3 + $0x18] sm:$0xff]   ;;  %v1519_v23 = vld [vmem:[%s1851_s3 + $0x30] sm:$0xff]   ;;  %v1521_v25 = vld [vmem:[%s1852_s5] sm:$0xff]  }
   0x9   :  { %1399 = vmatpush3.bf16.msra.mxu1 %v1513_v12  ;;  %v1512_v21 = vld [vmem:[%s1850_s0 + $0x78] sm:$0xff]   ;;  %v1522_v26 = vld [vmem:[%s1852_s5 + $0x8] sm:$0xff]   ;;  %1446 = vmatprep.subr.bf16.mxu0 %v1521_v25  ;;  %v1523_v27 = vld [vmem:[%s1852_s5 + $0x10] sm:$0xff]  }
   0xa   :  { %1400 = vmatprep.subr.bf16.mxu1 %v1514_v13  ;;  %v1520_v24 = vld [vmem:[%s1851_s3 + $0x38] sm:$0xff]   ;;  %1447 = vmatpush3.bf16.msra.mxu0 %v1521_v25  ;;  %v1525_v29 = vld [vmem:[%s1852_s5 + $0x20] sm:$0xff]   ;;  %v1526_v30 = vld [vmem:[%s1852_s5 + $0x28] sm:$0xff]  }
   0xb   :  { %1448 = vmatprep.subr.bf16.mxu0 %v1522_v26  ;;  %v1524_v28 = vld [vmem:[%s1852_s5 + $0x18] sm:$0xff]   ;;  %v1681_v31 = vld [vmem:[%s1853_s2] ss:$0 sm:$0xff] }
   0xd   :  { %1401 = vmatpush3.bf16.msra.mxu1 %v1514_v13 }
   0xe   :  { %1371 = vmatmul.mubr.msk.bf16.gmra.mrb[4].mxu0 %vm154_vm0, %v1500_v4  ;;  %1402 = vmatprep.subr.bf16.mxu1 %v1515_v15 }
   0xf   :  { %1374 = vmatprep.mubr.msk.bf16.mxu0 %vm154_vm0, %v1501_v5  ;;  %1387 = vmatmul.mubr.msk.bf16.gmra.mrb[4].mxu1 %vm154_vm0, %v1508_v9 }
  0x10   :  { %1390 = vmatprep.mubr.msk.bf16.mxu1 %vm154_vm0, %v1509_v11  ;;  %1449 = vmatpush3.bf16.msra.mxu0 %v1522_v26 }
  0x11   :  { %1403 = vmatpush3.bf16.msra.mxu1 %v1515_v15  ;;  %1450 = vmatprep.subr.bf16.mxu0 %v1523_v27 }
  0x12   :  { %1404 = vmatprep.subr.bf16.mxu1 %v1516_v19 }
  0x14   :  { %1451 = vmatpush3.bf16.msra.mxu0 %v1523_v27 }
  0x15   :  { %1405 = vmatpush3.bf16.msra.mxu1 %v1516_v19  ;;  %1452 = vmatprep.subr.bf16.mxu0 %v1524_v28 }
  0x16   :  { %1375 = vmatmul.mubr.msk.bf16.gmra.mrb[8].mxu0 %vm154_vm0, %v1502_v10  ;;  %1406 = vmatprep.subr.bf16.mxu1 %v1517_v20 }
  0x17   :  { %1378 = vmatprep.mubr.msk.bf16.mxu0 %vm154_vm0, %v1503_v14  ;;  %1391 = vmatmul.mubr.msk.bf16.gmra.mrb[8].mxu1 %vm154_vm0, %v1510_v16 }
  0x18   :  { %1394 = vmatprep.mubr.msk.bf16.mxu1 %vm154_vm0, %v1511_v17  ;;  %1453 = vmatpush3.bf16.msra.mxu0 %v1524_v28 }
  0x19   :  { %1407 = vmatpush3.bf16.msra.mxu1 %v1517_v20  ;;  %1454 = vmatprep.subr.bf16.mxu0 %v1525_v29 }
  0x1a   :  { %1408 = vmatprep.subr.bf16.mxu1 %v1518_v22 }
  0x1c   :  { %1455 = vmatpush3.bf16.msra.mxu0 %v1525_v29 }
  0x1d   :  { %1409 = vmatpush3.bf16.msra.mxu1 %v1518_v22  ;;  %1456 = vmatprep.subr.bf16.mxu0 %v1526_v30 }
  0x1e   :  { %1379 = vmatmul.mubr.msk.bf16.gmra.mrb[12].mxu0 %vm154_vm0, %v1504_v18  ;;  %1410 = vmatprep.subr.bf16.mxu1 %v1519_v23 }
  0x1f   :  { %1395 = vmatmul.mubr.msk.bf16.gmra.mrb[12].mxu1 %vm154_vm0, %v1512_v21 }
  0x20   :  { %1457 = vmatpush3.bf16.msra.mxu0 %v1526_v30 }
  0x21   :  { %1411 = vmatpush3.bf16.msra.mxu1 %v1519_v23 }
  0x22   :  { %1412 = vmatprep.subr.bf16.mxu1 %v1520_v24 }
  0x25   :  { %1413 = vmatpush3.bf16.msra.mxu1 %v1520_v24 }
  0xd9   :  { %v1368_v32 = vpop.f32.mrb[0].mxu0 }
  0xda   :  { %v246_v33 = vadd.f32 %v1368_v32, %v1681_v31  ;;  %v237_v34 = vpop.f32.mrb[1].mxu0  ;;  %v1384_v44 = vpop.f32.mrb[0].mxu1 }
  0xdb   :  { %v238_v35 = vadd.f32 %v1681_v31, %v237_v34  ;;  %v1369_v36 = vpop.f32.mrb[2].mxu0  ;;  %v310_v46 = vadd.f32 %v1384_v44, %v1681_v31  ;;  %v301_v47 = vpop.f32.mrb[1].mxu1 }
  0xdc   :  { %v249_v37 = vadd.f32 %v1369_v36, %v1681_v31  ;;  %v240_v38 = vpop.f32.mrb[3].mxu0  ;;  %v366_v40 = vmax.f32 %v246_v33, 0.0  ;;  %v302_v50 = vadd.f32 %v1681_v31, %v301_v47  ;;  %v1385_v51 = vpop.f32.mrb[2].mxu1 }
  0xdd   :  { %v241_v39 = vadd.f32 %v1681_v31, %v240_v38  ;;  %v364_v42 = vmax.f32 %v238_v35, 0.0  ;;  %v382_v54 = vmax.f32 %v310_v46, 0.0  ;;  %v313_v55 = vadd.f32 %v1385_v51, %v1681_v31  ;;  %v304_v56 = vpop.f32.mrb[3].mxu1 }
  0xde   :  { %v367_v41 = vmax.f32 %v249_v37, 0.0  ;;  %v380_v59 = vmax.f32 %v302_v50, 0.0  ;;  %v305_v60 = vadd.f32 %v1681_v31, %v304_v56 }
  0xdf   :  { %v365_v43 = vmax.f32 %v241_v39, 0.0  ;;  %v383_v63 = vmax.f32 %v313_v55, 0.0 }
  0xe0   :  { %v397_v45 = vpack.c.bf16 %v367_v41, %v366_v40  ;;  %v381_v1 = vmax.f32 %v305_v60, 0.0 }
  0xe1   :  { %v396_v48 = vpack.c.bf16 %v365_v43, %v364_v42  ;;  %v1372_v49 = vpop.f32.mrb[4].mxu0  ;;  %v1695_v4 = vpack.c.bf16 %v383_v63, %v382_v54 }
  0xe2   :  { %v262_v52 = vadd.f32 %v1372_v49, %v1681_v31  ;;  %v253_v53 = vpop.f32.mrb[5].mxu0  ;;  %v1697_v7 = vpack.c.bf16 %v381_v1, %v380_v59  ;;  %v1388_v8 = vpop.f32.mrb[4].mxu1 }
  0xe3   :  { %v254_v57 = vadd.f32 %v1681_v31, %v253_v53  ;;  %v1373_v58 = vpop.f32.mrb[6].mxu0  ;;  %1414 = vmatprep.mubr.bf16.mxu1 %v396_v48  ;;  %v326_v10 = vadd.f32 %v1388_v8, %v1681_v31  ;;  %v317_v11 = vpop.f32.mrb[5].mxu1 }
  0xe4   :  { %v265_v61 = vadd.f32 %v1373_v58, %v1681_v31  ;;  %v256_v62 = vpop.f32.mrb[7].mxu0  ;;  %1415 = vmatmul.mubr.bf16.vlgmr.msra.gmra.mrb[16].mxu1 %v397_v45  ;;  %v370_v2 = vmax.f32 %v262_v52, 0.0  ;;  %v318_v14 = vadd.f32 %v1681_v31, %v317_v11  ;;  %v1389_v15 = vpop.f32.mrb[6].mxu1 }
  0xe5   :  { %v257_v0 = vadd.f32 %v1681_v31, %v256_v62  ;;  %v368_v5 = vmax.f32 %v254_v57, 0.0  ;;  %v386_v18 = vmax.f32 %v326_v10, 0.0  ;;  %v329_v19 = vadd.f32 %v1389_v15, %v1681_v31  ;;  %v320_v20 = vpop.f32.mrb[7].mxu1 }
  0xe6   :  { %v371_v3 = vmax.f32 %v265_v61, 0.0  ;;  %v384_v23 = vmax.f32 %v318_v14, 0.0  ;;  %v321_v24 = vadd.f32 %v1681_v31, %v320_v20 }
  0xe7   :  { %v369_v6 = vmax.f32 %v257_v0, 0.0  ;;  %v387_v27 = vmax.f32 %v329_v19, 0.0  ;;  %v1527_v19 = vld [vmem:[%s1852_s5 + $0x30] sm:$0xff]  }
  0xe8   :  { %v399_v9 = vpack.c.bf16 %v371_v3, %v370_v2  ;;  %v385_v29 = vmax.f32 %v321_v24, 0.0  ;;  %1458 = vmatprep.subr.bf16.mxu0 %v1527_v19 }
  0xe9   :  { %v398_v12 = vpack.c.bf16 %v369_v6, %v368_v5  ;;  %v1376_v13 = vpop.f32.mrb[8].mxu0  ;;  %v407_v33 = vpack.c.bf16 %v387_v27, %v386_v18  ;;  %1459 = vmatpush3.bf16.msra.mxu0 %v1527_v19 }
  0xea   :  { %v278_v16 = vadd.f32 %v1376_v13, %v1681_v31  ;;  %v269_v17 = vpop.f32.mrb[9].mxu0  ;;  %v406_v36 = vpack.c.bf16 %v385_v29, %v384_v23  ;;  %v1392_v37 = vpop.f32.mrb[8].mxu1 }
  0xeb   :  { %v270_v21 = vadd.f32 %v1681_v31, %v269_v17  ;;  %v1377_v22 = vpop.f32.mrb[10].mxu0  ;;  %1418 = vmatprep.mubr.bf16.mxu1 %v398_v12  ;;  %v342_v39 = vadd.f32 %v1392_v37, %v1681_v31  ;;  %v333_v40 = vpop.f32.mrb[9].mxu1 }
  0xec   :  { %v281_v25 = vadd.f32 %v1377_v22, %v1681_v31  ;;  %v272_v26 = vpop.f32.mrb[11].mxu0  ;;  %1419 = vmatmul.mubr.bf16.gmra.mrb[20].mxu1 %v399_v9  ;;  %v374_v30 = vmax.f32 %v278_v16, 0.0  ;;  %v334_v43 = vadd.f32 %v1681_v31, %v333_v40  ;;  %v1393_v44 = vpop.f32.mrb[10].mxu1 }
  0xed   :  { %v273_v28 = vadd.f32 %v1681_v31, %v272_v26  ;;  %v372_v34 = vmax.f32 %v270_v21, 0.0  ;;  %v390_v47 = vmax.f32 %v342_v39, 0.0  ;;  %v345_v48 = vadd.f32 %v1393_v44, %v1681_v31  ;;  %v336_v49 = vpop.f32.mrb[11].mxu1 }
  0xee   :  { %v375_v32 = vmax.f32 %v281_v25, 0.0  ;;  %v388_v52 = vmax.f32 %v334_v43, 0.0  ;;  %v337_v53 = vadd.f32 %v1681_v31, %v336_v49 }
  0xef   :  { %v373_v35 = vmax.f32 %v273_v28, 0.0  ;;  %v391_v56 = vmax.f32 %v345_v48, 0.0 }
  0xf0   :  { %v401_v38 = vpack.c.bf16 %v375_v32, %v374_v30  ;;  %v389_v58 = vmax.f32 %v337_v53, 0.0 }
  0xf1   :  { %v400_v41 = vpack.c.bf16 %v373_v35, %v372_v34  ;;  %v1380_v42 = vpop.f32.mrb[12].mxu0  ;;  %v409_v61 = vpack.c.bf16 %v391_v56, %v390_v47 }
  0xf2   :  { %v294_v45 = vadd.f32 %v1380_v42, %v1681_v31  ;;  %v285_v46 = vpop.f32.mrb[13].mxu0  ;;  %v408_v0 = vpack.c.bf16 %v389_v58, %v388_v52  ;;  %v1396_v1 = vpop.f32.mrb[12].mxu1 }
  0xf3   :  { %v286_v50 = vadd.f32 %v1681_v31, %v285_v46  ;;  %v1381_v51 = vpop.f32.mrb[14].mxu0  ;;  %1422 = vmatprep.mubr.bf16.mxu1 %v400_v41  ;;  %v358_v3 = vadd.f32 %v1396_v1, %v1681_v31  ;;  %v349_v5 = vpop.f32.mrb[13].mxu1 }
  0xf4   :  { %v297_v54 = vadd.f32 %v1381_v51, %v1681_v31  ;;  %v288_v55 = vpop.f32.mrb[15].mxu0  ;;  %1423 = vmatmul.mubr.bf16.gmra.mrb[24].mxu1 %v401_v38  ;;  %v378_v59 = vmax.f32 %v294_v45, 0.0  ;;  %v350_v8 = vadd.f32 %v1681_v31, %v349_v5  ;;  %v1397_v9 = vpop.f32.mrb[14].mxu1 }
  0xf5   :  { %v289_v57 = vadd.f32 %v1681_v31, %v288_v55  ;;  %v376_v62 = vmax.f32 %v286_v50, 0.0  ;;  %v394_v10 = vmax.f32 %v358_v3, 0.0  ;;  %v361_v11 = vadd.f32 %v1397_v9, %v1681_v31  ;;  %v352_v12 = vpop.f32.mrb[15].mxu1 }
  0xf6   :  { %v379_v60 = vmax.f32 %v297_v54, 0.0  ;;  %v392_v13 = vmax.f32 %v350_v8, 0.0  ;;  %v353_v14 = vadd.f32 %v1681_v31, %v352_v12  ;;  %v1528_v31 = vld [vmem:[%s1852_s5 + $0x38] sm:$0xff]  }
  0xf7   :  { %v377_v63 = vmax.f32 %v289_v57, 0.0  ;;  %v395_v15 = vmax.f32 %v361_v11, 0.0  ;;  %1460 = vmatprep.subr.bf16.mxu0 %v1528_v31 }
  0xf8   :  { %v403_v2 = vpack.c.bf16 %v379_v60, %v378_v59  ;;  %v393_v16 = vmax.f32 %v353_v14, 0.0  ;;  %1461 = vmatpush3.bf16.msra.mxu0 %v1528_v31 }
  0xf9   :  { %v402_v6 = vpack.c.bf16 %v377_v63, %v376_v62  ;;  %v411_v17 = vpack.c.bf16 %v395_v15, %v394_v10 }
  0xfa   :  { %v410_v18 = vpack.c.bf16 %v393_v16, %v392_v13 }
  0xfb   :  { %1426 = vmatprep.mubr.bf16.mxu1 %v402_v6 }
  0xfc   :  { %1427 = vmatmul.mubr.bf16.gmra.mrb[28].mxu1 %v403_v2 }
  0xfd   :  { %1430 = vmatprep.mubr.bf16.mxu1 %v1697_v7 }
 0x104   :  { %1431 = vmatmul.mubr.bf16.gmra.mrb[32].mxu1 %v1695_v4  ;;  %v1730_v4 = vld [vmem:[%s1854_s4] ss:$0 sm:$0xff] }
 0x105   :  { %1434 = vmatprep.mubr.bf16.mxu1 %v406_v36 }
 0x10c   :  { %1435 = vmatmul.mubr.bf16.gmra.mrb[36].mxu1 %v407_v33 }
 0x10d   :  { %1438 = vmatprep.mubr.bf16.mxu1 %v408_v0 }
 0x114   :  { %1439 = vmatmul.mubr.bf16.gmra.mrb[40].mxu1 %v409_v61 }
 0x115   :  { %1442 = vmatprep.mubr.bf16.mxu1 %v410_v18 }
 0x11c   :  { %1443 = vmatmul.mubr.bf16.gmra.mrb[44].mxu1 %v411_v17 }
 0x1b7   :  { %v1416_v7 = vpop.f32.mrb[16].mxu1 }
 0x1b8   :  { %v526_v20 = vadd.f32 %v1416_v7, %v1730_v4  ;;  %v517_v21 = vpop.f32.mrb[17].mxu1 }
 0x1b9   :  { %v518_v22 = vadd.f32 %v1730_v4, %v517_v21  ;;  %v1417_v23 = vpop.f32.mrb[18].mxu1 }
 0x1ba   :  { %v529_v24 = vadd.f32 %v1417_v23, %v1730_v4  ;;  %v520_v25 = vpop.f32.mrb[19].mxu1  ;;  %v646_v27 = vmax.f32 %v526_v20, 0.0 }
 0x1bb   :  { %v521_v26 = vadd.f32 %v1730_v4, %v520_v25  ;;  %v644_v29 = vmax.f32 %v518_v22, 0.0 }
 0x1bc   :  { %v647_v28 = vmax.f32 %v529_v24, 0.0 }
 0x1bd   :  { %v645_v30 = vmax.f32 %v521_v26, 0.0 }
 0x1be   :  { %v677_v32 = vpack.c.bf16 %v647_v28, %v646_v27 }
 0x1bf   :  { %v676_v33 = vpack.c.bf16 %v645_v30, %v644_v29  ;;  %v1420_v34 = vpop.f32.mrb[20].mxu1 }
 0x1c0   :  { %v542_v35 = vadd.f32 %v1420_v34, %v1730_v4  ;;  %v533_v36 = vpop.f32.mrb[21].mxu1 }
 0x1c1   :  { %v534_v37 = vadd.f32 %v1730_v4, %v533_v36  ;;  %v1421_v38 = vpop.f32.mrb[22].mxu1  ;;  %1462 = vmatprep.mubr.bf16.mxu0 %v676_v33 }
 0x1c2   :  { %v545_v39 = vadd.f32 %v1421_v38, %v1730_v4  ;;  %v536_v40 = vpop.f32.mrb[23].mxu1  ;;  %1463 = vmatmul.mubr.bf16.vlgmr.msra.gmra.mrb[16].mxu0 %v677_v32  ;;  %v650_v42 = vmax.f32 %v542_v35, 0.0 }
 0x1c3   :  { %v537_v41 = vadd.f32 %v1730_v4, %v536_v40  ;;  %v648_v44 = vmax.f32 %v534_v37, 0.0 }
 0x1c4   :  { %v651_v43 = vmax.f32 %v545_v39, 0.0 }
 0x1c5   :  { %v649_v45 = vmax.f32 %v537_v41, 0.0 }
 0x1c6   :  { %v679_v46 = vpack.c.bf16 %v651_v43, %v650_v42 }
 0x1c7   :  { %v678_v47 = vpack.c.bf16 %v649_v45, %v648_v44  ;;  %v1424_v48 = vpop.f32.mrb[24].mxu1 }
 0x1c8   :  { %v558_v49 = vadd.f32 %v1424_v48, %v1730_v4  ;;  %v549_v50 = vpop.f32.mrb[25].mxu1 }
 0x1c9   :  { %v550_v51 = vadd.f32 %v1730_v4, %v549_v50  ;;  %v1425_v52 = vpop.f32.mrb[26].mxu1  ;;  %1466 = vmatprep.mubr.bf16.mxu0 %v678_v47 }
 0x1ca   :  { %v561_v53 = vadd.f32 %v1425_v52, %v1730_v4  ;;  %v552_v54 = vpop.f32.mrb[27].mxu1  ;;  %1467 = vmatmul.mubr.bf16.gmra.mrb[20].mxu0 %v679_v46  ;;  %v654_v56 = vmax.f32 %v558_v49, 0.0 }
 0x1cb   :  { %v553_v55 = vadd.f32 %v1730_v4, %v552_v54  ;;  %v652_v58 = vmax.f32 %v550_v51, 0.0 }
 0x1cc   :  { %v655_v57 = vmax.f32 %v561_v53, 0.0 }
 0x1cd   :  { %v653_v59 = vmax.f32 %v553_v55, 0.0 }
 0x1ce   :  { %v681_v60 = vpack.c.bf16 %v655_v57, %v654_v56 }
 0x1cf   :  { %v680_v61 = vpack.c.bf16 %v653_v59, %v652_v58  ;;  %v1428_v62 = vpop.f32.mrb[28].mxu1 }
 0x1d0   :  { %v574_v63 = vadd.f32 %v1428_v62, %v1730_v4  ;;  %v565_v0 = vpop.f32.mrb[29].mxu1 }
 0x1d1   :  { %v566_v1 = vadd.f32 %v1730_v4, %v565_v0  ;;  %v1429_v2 = vpop.f32.mrb[30].mxu1  ;;  %1470 = vmatprep.mubr.bf16.mxu0 %v680_v61 }
 0x1d2   :  { %v577_v3 = vadd.f32 %v1429_v2, %v1730_v4  ;;  %v568_v5 = vpop.f32.mrb[31].mxu1  ;;  %1471 = vmatmul.mubr.bf16.gmra.mrb[24].mxu0 %v681_v60  ;;  %v658_v8 = vmax.f32 %v574_v63, 0.0 }
 0x1d3   :  { %v569_v6 = vadd.f32 %v1730_v4, %v568_v5  ;;  %v656_v10 = vmax.f32 %v566_v1, 0.0 }
 0x1d4   :  { %v659_v9 = vmax.f32 %v577_v3, 0.0 }
 0x1d5   :  { %v657_v11 = vmax.f32 %v569_v6, 0.0 }
 0x1d6   :  { %v683_v12 = vpack.c.bf16 %v659_v9, %v658_v8  ;;  %v1767_v8 = vld [vmem:[%s1855_s6] ss:$0 sm:$0xff] }
 0x1d7   :  { %v682_v13 = vpack.c.bf16 %v657_v11, %v656_v10  ;;  %v1432_v14 = vpop.f32.mrb[32].mxu1 }
 0x1d8   :  { %v590_v15 = vadd.f32 %v1432_v14, %v1730_v4  ;;  %v581_v16 = vpop.f32.mrb[33].mxu1 }
 0x1d9   :  { %v582_v17 = vadd.f32 %v1730_v4, %v581_v16  ;;  %v1433_v18 = vpop.f32.mrb[34].mxu1  ;;  %1474 = vmatprep.mubr.bf16.mxu0 %v682_v13 }
 0x1da   :  { %v593_v19 = vadd.f32 %v1433_v18, %v1730_v4  ;;  %v584_v31 = vpop.f32.mrb[35].mxu1  ;;  %1475 = vmatmul.mubr.bf16.gmra.mrb[28].mxu0 %v683_v12  ;;  %v662_v20 = vmax.f32 %v590_v15, 0.0 }
 0x1db   :  { %v585_v7 = vadd.f32 %v1730_v4, %v584_v31  ;;  %v660_v22 = vmax.f32 %v582_v17, 0.0 }
 0x1dc   :  { %v663_v21 = vmax.f32 %v593_v19, 0.0 }
 0x1dd   :  { %v661_v23 = vmax.f32 %v585_v7, 0.0 }
 0x1de   :  { %v685_v24 = vpack.c.bf16 %v663_v21, %v662_v20 }
 0x1df   :  { %v684_v25 = vpack.c.bf16 %v661_v23, %v660_v22  ;;  %v1436_v26 = vpop.f32.mrb[36].mxu1 }
 0x1e0   :  { %v606_v27 = vadd.f32 %v1436_v26, %v1730_v4  ;;  %v597_v28 = vpop.f32.mrb[37].mxu1 }
 0x1e1   :  { %v598_v29 = vadd.f32 %v1730_v4, %v597_v28  ;;  %v1437_v30 = vpop.f32.mrb[38].mxu1  ;;  %1478 = vmatprep.mubr.bf16.mxu0 %v684_v25 }
 0x1e2   :  { %v609_v32 = vadd.f32 %v1437_v30, %v1730_v4  ;;  %v600_v33 = vpop.f32.mrb[39].mxu1  ;;  %1479 = vmatmul.mubr.bf16.gmra.mrb[32].mxu0 %v685_v24  ;;  %v666_v35 = vmax.f32 %v606_v27, 0.0 }
 0x1e3   :  { %v601_v34 = vadd.f32 %v1730_v4, %v600_v33  ;;  %v664_v37 = vmax.f32 %v598_v29, 0.0 }
 0x1e4   :  { %v667_v36 = vmax.f32 %v609_v32, 0.0 }
 0x1e5   :  { %v665_v38 = vmax.f32 %v601_v34, 0.0 }
 0x1e6   :  { %v687_v39 = vpack.c.bf16 %v667_v36, %v666_v35 }
 0x1e7   :  { %v686_v40 = vpack.c.bf16 %v665_v38, %v664_v37  ;;  %v1440_v41 = vpop.f32.mrb[40].mxu1 }
 0x1e8   :  { %v622_v42 = vadd.f32 %v1440_v41, %v1730_v4  ;;  %v613_v43 = vpop.f32.mrb[41].mxu1 }
 0x1e9   :  { %v614_v44 = vadd.f32 %v1730_v4, %v613_v43  ;;  %v1441_v45 = vpop.f32.mrb[42].mxu1  ;;  %1482 = vmatprep.mubr.bf16.mxu0 %v686_v40 }
 0x1ea   :  { %v625_v46 = vadd.f32 %v1441_v45, %v1730_v4  ;;  %v616_v47 = vpop.f32.mrb[43].mxu1  ;;  %1483 = vmatmul.mubr.bf16.gmra.mrb[36].mxu0 %v687_v39  ;;  %v670_v49 = vmax.f32 %v622_v42, 0.0 }
 0x1eb   :  { %v617_v48 = vadd.f32 %v1730_v4, %v616_v47  ;;  %v668_v51 = vmax.f32 %v614_v44, 0.0 }
 0x1ec   :  { %v671_v50 = vmax.f32 %v625_v46, 0.0 }
 0x1ed   :  { %v669_v52 = vmax.f32 %v617_v48, 0.0 }
 0x1ee   :  { %v689_v53 = vpack.c.bf16 %v671_v50, %v670_v49 }
 0x1ef   :  { %v688_v54 = vpack.c.bf16 %v669_v52, %v668_v51  ;;  %v1444_v55 = vpop.f32.mrb[44].mxu1 }
 0x1f0   :  { %v638_v56 = vadd.f32 %v1444_v55, %v1730_v4  ;;  %v629_v57 = vpop.f32.mrb[45].mxu1 }
 0x1f1   :  { %v630_v58 = vadd.f32 %v1730_v4, %v629_v57  ;;  %v1445_v59 = vpop.f32.mrb[46].mxu1  ;;  %1486 = vmatprep.mubr.bf16.mxu0 %v688_v54 }
 0x1f2   :  { %v641_v60 = vadd.f32 %v1445_v59, %v1730_v4  ;;  %v632_v61 = vpop.f32.mrb[47].mxu1  ;;  %1487 = vmatmul.mubr.bf16.gmra.mrb[40].mxu0 %v689_v53  ;;  %v674_v63 = vmax.f32 %v638_v56, 0.0 }
 0x1f3   :  { %v633_v62 = vadd.f32 %v1730_v4, %v632_v61  ;;  %v672_v1 = vmax.f32 %v630_v58, 0.0 }
 0x1f4   :  { %v675_v0 = vmax.f32 %v641_v60, 0.0 }
 0x1f5   :  { %v673_v2 = vmax.f32 %v633_v62, 0.0 }
 0x1f6   :  { %v691_v3 = vpack.c.bf16 %v675_v0, %v674_v63 }
 0x1f7   :  { %v690_v5 = vpack.c.bf16 %v673_v2, %v672_v1 }
 0x1f9   :  { %1490 = vmatprep.mubr.bf16.mxu0 %v690_v5 }
 0x1fa   :  { %1491 = vmatmul.mubr.bf16.gmra.mrb[44].mxu0 %v691_v3 }
 0x295   :  { %v1464_v6 = vpop.f32.mrb[16].mxu0 }
 0x296   :  { %v797_v9 = vpop.f32.mrb[17].mxu0  ;;  %v806_v11 = vadd.f32 %v1464_v6, %v1767_v8 }
 0x297   :  { %v1465_v10 = vpop.f32.mrb[18].mxu0  ;;  %v798_v13 = vadd.f32 %v1767_v8, %v797_v9 }
 0x298   :  { %v809_v4 = vadd.f32 %v1465_v10, %v1767_v8  ;;  %v800_v12 = vpop.f32.mrb[19].mxu0 }
 0x299   :  { %v801_v14 = vadd.f32 %v1767_v8, %v800_v12 }
 0x29a   :  { %v1212_v15 = vpack.c.bf16 %v809_v4, %v806_v11 }
 0x29b   :  { %v1207_v16 = vpack.c.bf16 %v801_v14, %v798_v13 }
 0x29c   :  { %1284 = vst [vmem:[%s1856_s7 + $0x8] sm:$0xff] %v1212_v15  }
 0x29d   :  { %1208 = vst [vmem:[%s1856_s7] sm:$0xff] %v1207_v16   ;;  %v1468_v17 = vpop.f32.mrb[20].mxu0 }
 0x29e   :  { %v813_v18 = vpop.f32.mrb[21].mxu0  ;;  %v822_v31 = vadd.f32 %v1468_v17, %v1767_v8 }
 0x29f   :  { %v1469_v19 = vpop.f32.mrb[22].mxu0  ;;  %v814_v21 = vadd.f32 %v1767_v8, %v813_v18 }
 0x2a0   :  { %v825_v7 = vadd.f32 %v1469_v19, %v1767_v8  ;;  %v816_v20 = vpop.f32.mrb[23].mxu0 }
 0x2a1   :  { %v817_v22 = vadd.f32 %v1767_v8, %v816_v20 }
 0x2a2   :  { %v1222_v23 = vpack.c.bf16 %v825_v7, %v822_v31 }
 0x2a3   :  { %v1217_v24 = vpack.c.bf16 %v817_v22, %v814_v21 }
 0x2a4   :  { %1286 = vst [vmem:[%s1856_s7 + $0x18] sm:$0xff] %v1222_v23  }
 0x2a5   :  { %1285 = vst [vmem:[%s1856_s7 + $0x10] sm:$0xff] %v1217_v24   ;;  %v1472_v25 = vpop.f32.mrb[24].mxu0 }
 0x2a6   :  { %v829_v26 = vpop.f32.mrb[25].mxu0  ;;  %v838_v28 = vadd.f32 %v1472_v25, %v1767_v8 }
 0x2a7   :  { %v1473_v27 = vpop.f32.mrb[26].mxu0  ;;  %v830_v32 = vadd.f32 %v1767_v8, %v829_v26 }
 0x2a8   :  { %v841_v29 = vadd.f32 %v1473_v27, %v1767_v8  ;;  %v832_v30 = vpop.f32.mrb[27].mxu0 }
 0x2a9   :  { %v833_v33 = vadd.f32 %v1767_v8, %v832_v30 }
 0x2aa   :  { %v1232_v34 = vpack.c.bf16 %v841_v29, %v838_v28 }
 0x2ab   :  { %v1227_v35 = vpack.c.bf16 %v833_v33, %v830_v32 }
 0x2ac   :  { %1288 = vst [vmem:[%s1856_s7 + $0x28] sm:$0xff] %v1232_v34  }
 0x2ad   :  { %1287 = vst [vmem:[%s1856_s7 + $0x20] sm:$0xff] %v1227_v35   ;;  %v1476_v36 = vpop.f32.mrb[28].mxu0 }
 0x2ae   :  { %v845_v37 = vpop.f32.mrb[29].mxu0  ;;  %v854_v39 = vadd.f32 %v1476_v36, %v1767_v8 }
 0x2af   :  { %v1477_v38 = vpop.f32.mrb[30].mxu0  ;;  %v846_v42 = vadd.f32 %v1767_v8, %v845_v37 }
 0x2b0   :  { %v857_v40 = vadd.f32 %v1477_v38, %v1767_v8  ;;  %v848_v41 = vpop.f32.mrb[31].mxu0 }
 0x2b1   :  { %v849_v43 = vadd.f32 %v1767_v8, %v848_v41 }
 0x2b2   :  { %v1242_v44 = vpack.c.bf16 %v857_v40, %v854_v39 }
 0x2b3   :  { %v1237_v45 = vpack.c.bf16 %v849_v43, %v846_v42 }
 0x2b4   :  { %1290 = vst [vmem:[%s1856_s7 + $0x38] sm:$0xff] %v1242_v44  }
 0x2b5   :  { %1289 = vst [vmem:[%s1856_s7 + $0x30] sm:$0xff] %v1237_v45   ;;  %v1480_v46 = vpop.f32.mrb[32].mxu0 }
 0x2b6   :  { %v861_v47 = vpop.f32.mrb[33].mxu0  ;;  %v870_v49 = vadd.f32 %v1480_v46, %v1767_v8 }
 0x2b7   :  { %v1481_v48 = vpop.f32.mrb[34].mxu0  ;;  %v862_v52 = vadd.f32 %v1767_v8, %v861_v47 }
 0x2b8   :  { %v873_v50 = vadd.f32 %v1481_v48, %v1767_v8  ;;  %v864_v51 = vpop.f32.mrb[35].mxu0 }
 0x2b9   :  { %v865_v53 = vadd.f32 %v1767_v8, %v864_v51 }
 0x2ba   :  { %v1252_v54 = vpack.c.bf16 %v873_v50, %v870_v49 }
 0x2bb   :  { %v1247_v55 = vpack.c.bf16 %v865_v53, %v862_v52 }
 0x2bc   :  { %1292 = vst [vmem:[%s1856_s7 + $0x48] sm:$0xff] %v1252_v54  }
 0x2bd   :  { %1291 = vst [vmem:[%s1856_s7 + $0x40] sm:$0xff] %v1247_v55   ;;  %v1484_v56 = vpop.f32.mrb[36].mxu0 }
 0x2be   :  { %v877_v57 = vpop.f32.mrb[37].mxu0  ;;  %v886_v59 = vadd.f32 %v1484_v56, %v1767_v8 }
 0x2bf   :  { %v1485_v58 = vpop.f32.mrb[38].mxu0  ;;  %v878_v62 = vadd.f32 %v1767_v8, %v877_v57 }
 0x2c0   :  { %v889_v60 = vadd.f32 %v1485_v58, %v1767_v8  ;;  %v880_v61 = vpop.f32.mrb[39].mxu0 }
 0x2c1   :  { %v881_v63 = vadd.f32 %v1767_v8, %v880_v61 }
 0x2c2   :  { %v1262_v0 = vpack.c.bf16 %v889_v60, %v886_v59 }
 0x2c3   :  { %v1257_v1 = vpack.c.bf16 %v881_v63, %v878_v62 }
 0x2c4   :  { %1294 = vst [vmem:[%s1856_s7 + $0x58] sm:$0xff] %v1262_v0  }
 0x2c5   :  { %1293 = vst [vmem:[%s1856_s7 + $0x50] sm:$0xff] %v1257_v1   ;;  %v1488_v2 = vpop.f32.mrb[40].mxu0 }
 0x2c6   :  { %v893_v3 = vpop.f32.mrb[41].mxu0  ;;  %v902_v6 = vadd.f32 %v1488_v2, %v1767_v8 }
 0x2c7   :  { %v1489_v5 = vpop.f32.mrb[42].mxu0  ;;  %v894_v11 = vadd.f32 %v1767_v8, %v893_v3 }
 0x2c8   :  { %v905_v9 = vadd.f32 %v1489_v5, %v1767_v8  ;;  %v896_v10 = vpop.f32.mrb[43].mxu0 }
 0x2c9   :  { %v897_v4 = vadd.f32 %v1767_v8, %v896_v10 }
 0x2ca   :  { %v1272_v12 = vpack.c.bf16 %v905_v9, %v902_v6 }
 0x2cb   :  { %v1267_v13 = vpack.c.bf16 %v897_v4, %v894_v11 }
 0x2cc   :  { %1296 = vst [vmem:[%s1856_s7 + $0x68] sm:$0xff] %v1272_v12  }
 0x2cd   :  { %1295 = vst [vmem:[%s1856_s7 + $0x60] sm:$0xff] %v1267_v13   ;;  %v1492_v14 = vpop.f32.mrb[44].mxu0 }
 0x2ce   :  { %v909_v15 = vpop.f32.mrb[45].mxu0  ;;  %v918_v17 = vadd.f32 %v1492_v14, %v1767_v8 }
 0x2cf   :  { %v1493_v16 = vpop.f32.mrb[46].mxu0  ;;  %v910_v31 = vadd.f32 %v1767_v8, %v909_v15 }
 0x2d0   :  { %v921_v18 = vadd.f32 %v1493_v16, %v1767_v8  ;;  %v912_v19 = vpop.f32.mrb[47].mxu0 }
 0x2d1   :  { %v913_v7 = vadd.f32 %v1767_v8, %v912_v19 }
 0x2d2   :  { %v1282_v20 = vpack.c.bf16 %v921_v18, %v918_v17 }
 0x2d3   :  { %v1277_v21 = vpack.c.bf16 %v913_v7, %v910_v31 }
 0x2d4   :  { %1298 = vst [vmem:[%s1856_s7 + $0x78] sm:$0xff] %v1282_v20  }
 0x2d5   :  { %1297 = vst [vmem:[%s1856_s7 + $0x70] sm:$0xff] %v1277_v21  }

</bundles_post_ra>
